<compile_context>
chip_gen: v5e
topology: v5e:2x2
jax: 0.10.0
libtpu: 0.0.40
codegen_flags: <defaults>
</compile_context>

<pallas_src>
import jax
import jax.numpy as jnp
from jax.experimental import pallas as pl
from jax.experimental.pallas import tpu as pltpu


def _round_up(n, m):
    return ((n + m - 1) // m) * m


def mlp_kernel(x_ref, w1_ref, b1_ref, w2_ref, b2_ref, w3_ref, b3_ref, o_ref):
    # MXU operand dtype follows the weights (f32 or bf16); accumulation and
    # all elementwise work (bias add, ReLU) stay in f32 (v5e's VPU has no
    # bf16 elementwise path, and it keeps numerics tight).
    mm_dtype = w1_ref.dtype
    x = x_ref[...].astype(mm_dtype)  # in-kernel cast: cheap VPU op, no HBM cost

    # layer 1: Linear(input_dim, hidden) + ReLU
    h = jnp.dot(x, w1_ref[...], preferred_element_type=jnp.float32)
    h = jnp.maximum(h + b1_ref[...], 0.0)

    # layer 2: Linear(hidden, hidden) + ReLU   (num_layers=2 -> one hidden layer)
    h = jnp.dot(h.astype(mm_dtype), w2_ref[...],
                preferred_element_type=jnp.float32)
    h = jnp.maximum(h + b2_ref[...], 0.0)

    # output layer: Linear(hidden, output_dim), no activation
    y = jnp.dot(h.astype(mm_dtype), w3_ref[...],
                preferred_element_type=jnp.float32)
    o_ref[...] = (y + b3_ref[...]).astype(o_ref.dtype)


def mlp_forward(x, params, *, block_b=4096, operand_dtype=jnp.bfloat16):
    """x: [B, input_dim] float32.  params: dict from init_mlp_params.

    block_b:       rows per grid step (primary tuning knob).  Defaults large
                   so per-step grid overhead is amortized; it is split
                   automatically so the grid has >=2 steps (v7x megacore).
    operand_dtype: MXU operand dtype for x/weights.  bf16 (default, good on
                   v5e/v6e/v7x) or None for pure-f32 matmuls.  Accumulation,
                   bias add and ReLU are always f32.
    """
    w1, b1, w2, b2, w3, b3 = (params["w1"], params["b1"], params["w2"],
                              params["b2"], params["w3"], params["b3"])
    B, d_in = x.shape
    d_h = w1.shape[1]
    d_out = w3.shape[1]

    # Weights are tiny -> casting them in the wrapper is negligible and halves
    # their HBM traffic.  x stays f32 (cast happens inside the kernel).
    if operand_dtype is not None:
        w1 = w1.astype(operand_dtype)
        w2 = w2.astype(operand_dtype)
        w3 = w3.astype(operand_dtype)

    # --- batch tiling: big tiles, >=2 grid steps when the batch allows ------
    row_align = 8  # x/out tiles are f32 -> sublane granularity of 8
    block_b = max(row_align, min(block_b, _round_up(B, row_align)))
    block_b = _round_up(block_b, row_align)
    if pl.cdiv(B, block_b) < 2 and B > row_align:
        # Split so dimension_semantics=("parallel",) can shard the grid across
        # both v7x TensorCores instead of leaving one idle.
        block_b = _round_up(pl.cdiv(B, 2), row_align)
    grid = (pl.cdiv(B, block_b),)
    # Ragged B: the last block's read is clamped and its write is masked by
    # Pallas, and each output row only depends on its own input row, so no
    # wrapper-side padding of x is needed.

    # NOTE: d_in=32 / d_h=128 underfill the 256-wide MXU on v6e/v7x; padding K
    # to 128 only matters once the kernel is MXU-bound (it is HBM/overhead
    # bound at these sizes), so it is intentionally left out.

    flops = 2 * B * (d_in * d_h + d_h * d_h + d_h * d_out)
    bytes_accessed = int(
        B * d_in * x.dtype.itemsize
        + sum(int(a.size) * a.dtype.itemsize for a in (w1, b1, w2, b2, w3, b3))
        + B * d_out * 4)

    in_specs = [
        pl.BlockSpec((block_b, d_in), lambda i: (i, 0)),   # x tile (streamed)
        pl.BlockSpec((d_in, d_h), lambda i: (0, 0)),       # w1 (VMEM resident)
        pl.BlockSpec((1, d_h), lambda i: (0, 0)),          # b1
        pl.BlockSpec((d_h, d_h), lambda i: (0, 0)),        # w2
        pl.BlockSpec((1, d_h), lambda i: (0, 0)),          # b2
        pl.BlockSpec((d_h, d_out), lambda i: (0, 0)),      # w3
        pl.BlockSpec((1, d_out), lambda i: (0, 0)),        # b3
    ]
    # Unpadded output block: full output width (<=128 lanes) -> 8x less HBM
    # writeback than a 128-lane padded slab when d_out=16; the DMA is still
    # fully contiguous in HBM because the block spans whole rows.
    out_spec = pl.BlockSpec((block_b, d_out), lambda i: (i, 0))

    return pl.pallas_call(
        mlp_kernel,
        out_shape=jax.ShapeDtypeStruct((B, d_out), jnp.float32),
        grid=grid,
        in_specs=in_specs,
        out_specs=out_spec,
        compiler_params=pltpu.CompilerParams(
            dimension_semantics=("parallel",),
            vmem_limit_bytes=32 * 1024 * 1024,  # safe on v5e/v6e/v7x
        ),
        cost_estimate=pl.CostEstimate(
            flops=flops, transcendentals=0, bytes_accessed=bytes_accessed),
    )(x, w1, b1, w2, b2, w3, b3)


def init_mlp_params(key, input_dim, output_dim, hidden_dim=128):
    """Deterministic init mimicking nn.Linear's U(-1/sqrt(fan_in), 1/sqrt(fan_in))."""
    ks = jax.random.split(key, 6)

    def linear(kw, kb, fan_in, fan_out):
        bound = 1.0 / jnp.sqrt(jnp.float32(fan_in))
        w = jax.random.uniform(kw, (fan_in, fan_out), jnp.float32, -bound, bound)
        b = jax.random.uniform(kb, (1, fan_out), jnp.float32, -bound, bound)
        return w, b

    w1, b1 = linear(ks[0], ks[1], input_dim, hidden_dim)
    w2, b2 = linear(ks[2], ks[3], hidden_dim, hidden_dim)
    w3, b3 = linear(ks[4], ks[5], hidden_dim, output_dim)
    return {"w1": w1, "b1": b1, "w2": w2, "b2": b2, "w3": w3, "b3": b3}


def mlp_reference(x, p):
    h = jnp.maximum(x @ p["w1"] + p["b1"], 0.0)
    h = jnp.maximum(h @ p["w2"] + p["b2"], 0.0)
    return h @ p["w3"] + p["b3"]


if __name__ == "__main__":
    key = jax.random.PRNGKey(0)
    k_x, k_p = jax.random.split(key)

    # Small but non-trivial: the >=2-step rule gives a 2-tile grid here.
    B, input_dim, hidden_dim, output_dim = 256, 32, 128, 16
    x = jax.random.normal(k_x, (B, input_dim), dtype=jnp.float32)
    params = init_mlp_params(k_p, input_dim, output_dim, hidden_dim)

    ref = mlp_reference(x, params)

    # Default path: bf16 MXU operands, f32 accumulation (looser tolerance).
    out_bf16 = jax.block_until_ready(mlp_forward(x, params))
    assert out_bf16.shape == (B, output_dim)
    assert jnp.allclose(out_bf16, ref, atol=5e-2, rtol=5e-2)

    # Pure-f32 path (tight tolerance).
    out_f32 = jax.block_until_ready(mlp_forward(x, params, operand_dtype=None))
    assert out_f32.shape == (B, output_dim)
    assert jnp.allclose(out_f32, ref, atol=1e-4, rtol=1e-4)

    # Ragged batch: exercises the clamped-read / masked-writeback last block.
    B2 = 200
    x2 = x[:B2]
    ref2 = mlp_reference(x2, params)
    out2 = jax.block_until_ready(mlp_forward(x2, params, operand_dtype=None))
    assert out2.shape == (B2, output_dim)
    assert jnp.allclose(out2, ref2, atol=1e-4, rtol=1e-4)

    print("KERNEL_OK")
</pallas_src>

<mosaic_0001>
module attributes {stable_mosaic.version = 11 : i64} {
  func.func @mlp_kernel(%arg0: i32, %arg1: memref<128x32xf32, #tpu.memory_space<vmem>>, %arg2: memref<32x128xbf16, #tpu.memory_space<vmem>>, %arg3: memref<1x128xf32, #tpu.memory_space<vmem>>, %arg4: memref<128x128xbf16, #tpu.memory_space<vmem>>, %arg5: memref<1x128xf32, #tpu.memory_space<vmem>>, %arg6: memref<128x16xbf16, #tpu.memory_space<vmem>>, %arg7: memref<1x16xf32, #tpu.memory_space<vmem>>, %arg8: memref<128x16xf32, #tpu.memory_space<vmem>>) attributes {dimension_semantics = [#tpu.dimension_semantics<parallel>], iteration_bounds = array<i64: 2>, scalar_prefetch = 0 : i64, scratch_operands = 0 : i64, tpu.core_type = #tpu.core_type<tc>, window_params = [{transform_indices = @transform_0, window_bounds = array<i64: 128, 32>}, {pipeline_mode = #tpu.pipeline_mode<synchronous>, transform_indices = @transform_1, window_bounds = array<i64: 32, 128>}, {pipeline_mode = #tpu.pipeline_mode<synchronous>, transform_indices = @transform_2, window_bounds = array<i64: 1, 128>}, {pipeline_mode = #tpu.pipeline_mode<synchronous>, transform_indices = @transform_3, window_bounds = array<i64: 128, 128>}, {pipeline_mode = #tpu.pipeline_mode<synchronous>, transform_indices = @transform_4, window_bounds = array<i64: 1, 128>}, {pipeline_mode = #tpu.pipeline_mode<synchronous>, transform_indices = @transform_5, window_bounds = array<i64: 128, 16>}, {pipeline_mode = #tpu.pipeline_mode<synchronous>, transform_indices = @transform_6, window_bounds = array<i64: 1, 16>}, {transform_indices = @transform_7, window_bounds = array<i64: 128, 16>}]} {
    %c0 = arith.constant 0 : index
    %c0_0 = arith.constant 0 : index
    %0 = vector.load %arg1[%c0, %c0_0] : memref<128x32xf32, #tpu.memory_space<vmem>>, vector<128x32xf32>
    %1 = arith.truncf %0 : vector<128x32xf32> to vector<128x32xbf16>
    %c0_1 = arith.constant 0 : index
    %c0_2 = arith.constant 0 : index
    %2 = vector.load %arg2[%c0_1, %c0_2] : memref<32x128xbf16, #tpu.memory_space<vmem>>, vector<32x128xbf16>
    %cst = arith.constant dense<0.000000e+00> : vector<128x128xf32>
    %3 = tpu.matmul %1, %2, %cst {dimension_numbers = #tpu.dot_dimension_numbers<[1], [0], [0], [1], [0, 0, 1, 1], [], []>} : vector<128x32xbf16>, vector<32x128xbf16>, vector<128x128xf32> -> vector<128x128xf32>
    %c0_3 = arith.constant 0 : index
    %c0_4 = arith.constant 0 : index
    %4 = vector.load %arg3[%c0_3, %c0_4] : memref<1x128xf32, #tpu.memory_space<vmem>>, vector<1x128xf32>
    %5 = vector.broadcast %4 : vector<1x128xf32> to vector<128x128xf32>
    %6 = arith.addf %3, %5 : vector<128x128xf32>
    %cst_5 = arith.constant 0.000000e+00 : f32
    %7 = vector.broadcast %cst_5 : f32 to vector<128x128xf32>
    %8 = arith.maximumf %6, %7 : vector<128x128xf32>
    %9 = arith.truncf %8 : vector<128x128xf32> to vector<128x128xbf16>
    %c0_6 = arith.constant 0 : index
    %c0_7 = arith.constant 0 : index
    %10 = vector.load %arg4[%c0_6, %c0_7] : memref<128x128xbf16, #tpu.memory_space<vmem>>, vector<128x128xbf16>
    %cst_8 = arith.constant dense<0.000000e+00> : vector<128x128xf32>
    %11 = tpu.matmul %9, %10, %cst_8 {dimension_numbers = #tpu.dot_dimension_numbers<[1], [0], [0], [1], [0, 0, 1, 1], [], []>} : vector<128x128xbf16>, vector<128x128xbf16>, vector<128x128xf32> -> vector<128x128xf32>
    %c0_9 = arith.constant 0 : index
    %c0_10 = arith.constant 0 : index
    %12 = vector.load %arg5[%c0_9, %c0_10] : memref<1x128xf32, #tpu.memory_space<vmem>>, vector<1x128xf32>
    %13 = vector.broadcast %12 : vector<1x128xf32> to vector<128x128xf32>
    %14 = arith.addf %11, %13 : vector<128x128xf32>
    %cst_11 = arith.constant 0.000000e+00 : f32
    %15 = vector.broadcast %cst_11 : f32 to vector<128x128xf32>
    %16 = arith.maximumf %14, %15 : vector<128x128xf32>
    %17 = arith.truncf %16 : vector<128x128xf32> to vector<128x128xbf16>
    %c0_12 = arith.constant 0 : index
    %c0_13 = arith.constant 0 : index
    %18 = vector.load %arg6[%c0_12, %c0_13] : memref<128x16xbf16, #tpu.memory_space<vmem>>, vector<128x16xbf16>
    %cst_14 = arith.constant dense<0.000000e+00> : vector<128x16xf32>
    %19 = tpu.matmul %17, %18, %cst_14 {dimension_numbers = #tpu.dot_dimension_numbers<[1], [0], [0], [1], [0, 0, 1, 1], [], []>} : vector<128x128xbf16>, vector<128x16xbf16>, vector<128x16xf32> -> vector<128x16xf32>
    %c0_15 = arith.constant 0 : index
    %c0_16 = arith.constant 0 : index
    %20 = vector.load %arg7[%c0_15, %c0_16] : memref<1x16xf32, #tpu.memory_space<vmem>>, vector<1x16xf32>
    %21 = vector.broadcast %20 : vector<1x16xf32> to vector<128x16xf32>
    %22 = arith.addf %19, %21 : vector<128x16xf32>
    %c0_17 = arith.constant 0 : index
    %c0_18 = arith.constant 0 : index
    %23 = vector.load %arg8[%c0_17, %c0_18] : memref<128x16xf32, #tpu.memory_space<vmem>>, vector<128x16xf32>
    tpu.vector_store %arg8[%c0_17, %c0_18], %22 {strides = array<i32>} : memref<128x16xf32, #tpu.memory_space<vmem>>, vector<128x16xf32>,
    return
  }
  func.func @transform_0(%arg0: i32) -> (i32, i32) {
    %c0_i32 = arith.constant 0 : i32
    %c0_i32_0 = arith.constant 0 : i32
    return %arg0, %c0_i32 : i32, i32
  }
  func.func @transform_1(%arg0: i32) -> (i32, i32) {
    %c0_i32 = arith.constant 0 : i32
    %c0_i32_0 = arith.constant 0 : i32
    %c0_i32_1 = arith.constant 0 : i32
    return %c0_i32, %c0_i32_0 : i32, i32
  }
  func.func @transform_2(%arg0: i32) -> (i32, i32) {
    %c0_i32 = arith.constant 0 : i32
    %c0_i32_0 = arith.constant 0 : i32
    %c0_i32_1 = arith.constant 0 : i32
    return %c0_i32, %c0_i32_0 : i32, i32
  }
  func.func @transform_3(%arg0: i32) -> (i32, i32) {
    %c0_i32 = arith.constant 0 : i32
    %c0_i32_0 = arith.constant 0 : i32
    %c0_i32_1 = arith.constant 0 : i32
    return %c0_i32, %c0_i32_0 : i32, i32
  }
  func.func @transform_4(%arg0: i32) -> (i32, i32) {
    %c0_i32 = arith.constant 0 : i32
    %c0_i32_0 = arith.constant 0 : i32
    %c0_i32_1 = arith.constant 0 : i32
    return %c0_i32, %c0_i32_0 : i32, i32
  }
  func.func @transform_5(%arg0: i32) -> (i32, i32) {
    %c0_i32 = arith.constant 0 : i32
    %c0_i32_0 = arith.constant 0 : i32
    %c0_i32_1 = arith.constant 0 : i32
    return %c0_i32, %c0_i32_0 : i32, i32
  }
  func.func @transform_6(%arg0: i32) -> (i32, i32) {
    %c0_i32 = arith.constant 0 : i32
    %c0_i32_0 = arith.constant 0 : i32
    %c0_i32_1 = arith.constant 0 : i32
    return %c0_i32, %c0_i32_0 : i32, i32
  }
  func.func @transform_7(%arg0: i32) -> (i32, i32) {
    %c0_i32 = arith.constant 0 : i32
    %c0_i32_0 = arith.constant 0 : i32
    return %arg0, %c0_i32 : i32, i32
  }
}

</mosaic_0001>

<bundles_post_ra>
// kernel: tpu_custom_call.1
= control target key start
LH: loop header
LB: loop body
LE: loop exit
PB: predicated region body
PF: predicated region fallthrough
CT: control target
= control target key end

     0   :  { %s940_s24 = smov 0   ;;  %s1105_s0 = inlined_call_operand.vmem [shape: f32[256,32], index: 0, kind: input, shape index: {}]   ;;  %s1106_s1 = inlined_call_operand.vmem [shape: bf16[32,128], index: 1, kind: input, shape index: {}]   ;;  %s1107_s2 = inlined_call_operand.vmem [shape: f32[1,128], index: 2, kind: input, shape index: {}]   ;;  %s1108_s3 = inlined_call_operand.vmem [shape: bf16[128,128], index: 3, kind: input, shape index: {}]   ;;  %s1109_s4 = inlined_call_operand.vmem [shape: f32[1,128], index: 4, kind: input, shape index: {}]   ;;  %s1110_s5 = inlined_call_operand.vmem [shape: bf16[128,16], index: 5, kind: input, shape index: {}]   ;;  %s1111_s6 = inlined_call_operand.vmem [shape: f32[1,16], index: 6, kind: input, shape index: {}]   ;;  %s1112_s7 = inlined_call_operand.vmem [shape: f32[256,16], index: 7, kind: output, shape index: {}]  }
   0x1 LB: > { %s756_s25 = sadd.s32 4294967295, %s898_s24   ;;  %p760_p0 = scmp.ge.s32.totalorder %s898_s24, 1  ;;  %s898_s24 = sphi %s940_s24, %s17_s24  }
   0x2   : > { %p238_p1 = scmp.lt.s32.totalorder %s898_s24, 3 }
   0x4   : > { %p239_p2 = pnand %p760_p0, %p238_p1 }
   0x5   : > { %s761_s28 = sshll.u32 (!%p239_p2), %s756_s25, 4 }
   0x6   : > { %242 = sbr.rel (%p239_p2) target bundleno = 560 (0x230), region = 48  ;;  %p271_p3 = scmp.lt.s32.totalorder (!%p239_p2), %s761_s28, 31 }
   0xb   : > { %v848_v0 = vld [vmem:[%s1106_s1 + $0x8] sm:$0xff]  ;;  %v847_v1 = vld [vmem:[%s1106_s1] sm:$0xff]  ;;  %s1114_s28 = smov (!%p271_p3, %s761_s28), 31  ;;  %vm327_vm0 = vcmask 261120   ;;  %v856_v17 = vld [vmem:[%s1108_s3 + $0x38] sm:$0xff]  ;;  %vm683_vm1 = vcmask 130048  }
   0xc   : > { %358 = vmatpush.bf16.msra.mxu0 %v848_v0  ;;  %s762_s8 = sshll.u32 %s1114_s28, 3  ;;  %493 = vmatpush.bf16.msra.mxu1 %v856_v17  ;;  %v855_v21 = vld [vmem:[%s1108_s3 + $0x30] sm:$0xff]  ;;  %v854_v22 = vld [vmem:[%s1108_s3 + $0x28] sm:$0xff]  ;;  %v853_v23 = vld [vmem:[%s1108_s3 + $0x20] sm:$0xff] }
   0xd   : > { %s962_s11 = scalar_lea.vmem %s1105_s0, %s762_s8  ;;  %865 = vmatpush.bf16.msra.mxu3 %v856_v17  ;;  %v852_v26 = vld [vmem:[%s1108_s3 + $0x18] sm:$0xff]  ;;  %v851_v28 = vld [vmem:[%s1108_s3 + $0x10] sm:$0xff]  ;;  %v850_v29 = vld [vmem:[%s1108_s3 + $0x8] sm:$0xff]  ;;  %s1068_s12 = scalar_lea.vmem %s1112_s7, %s762_s8 }
   0xe   : > { %v283_v2 = vld [vmem:[%s962_s11] sm:$0xff]  ;;  %v284_v3 = vld [vmem:[%s962_s11 + $0x8] sm:$0xff]  ;;  %v285_v5 = vld [vmem:[%s962_s11 + $0x10] sm:$0xff] }
   0xf   : > { %v299_v4 = vpack.c.bf16 %v284_v3, %v283_v2  ;;  %v286_v6 = vld [vmem:[%s962_s11 + $0x18] sm:$0xff]  ;;  %v287_v8 = vld [vmem:[%s962_s11 + $0x20] sm:$0xff]  ;;  %v288_v9 = vld [vmem:[%s962_s11 + $0x28] sm:$0xff] }
  0x10   : > { %359 = vmatpush.bf16.msra.mxu0 %v847_v1  ;;  %v300_v7 = vpack.c.bf16 %v286_v6, %v285_v5  ;;  %v301_v10 = vpack.c.bf16 %v288_v9, %v287_v8  ;;  %v289_v11 = vld [vmem:[%s962_s11 + $0x30] sm:$0xff]  ;;  %v290_v12 = vld [vmem:[%s962_s11 + $0x38] sm:$0xff]  ;;  %v291_v14 = vld [vmem:[%s962_s11 + $0x40] sm:$0xff]  ;;  %494 = vmatpush.bf16.msra.mxu1 %v855_v21 }
  0x11   : > { %v302_v13 = vpack.c.bf16 %v290_v12, %v289_v11  ;;  %v292_v15 = vld [vmem:[%s962_s11 + $0x48] sm:$0xff]  ;;  %v293_v18 = vld [vmem:[%s962_s11 + $0x50] sm:$0xff]  ;;  %v294_v19 = vld [vmem:[%s962_s11 + $0x58] sm:$0xff]  ;;  %866 = vmatpush.bf16.msra.mxu3 %v855_v21 }
  0x12   : > { %v303_v16 = vpack.c.bf16 %v292_v15, %v291_v14  ;;  %v304_v20 = vpack.c.bf16 %v294_v19, %v293_v18  ;;  %v295_v24 = vld [vmem:[%s962_s11 + $0x60] sm:$0xff]  ;;  %v296_v25 = vld [vmem:[%s962_s11 + $0x68] sm:$0xff]  ;;  %v297_v31 = vld [vmem:[%s962_s11 + $0x70] sm:$0xff] }
  0x13   : > { %773 = vmatmul.msk.bf16.vlgmr.msra.gmra.mxu0 %vm327_vm0, %v299_v4  ;;  %v305_v27 = vpack.c.bf16 %v296_v25, %v295_v24  ;;  %v849_v30 = vld [vmem:[%s1108_s3] sm:$0xff]  ;;  %v298_v32 = vld [vmem:[%s962_s11 + $0x78] sm:$0xff]  ;;  %v863_v14 = vld [vmem:[%s1110_s5 + $0x30] sm:$0xff] }
  0x14   : > { %495 = vmatpush.bf16.msra.mxu1 %v854_v22  ;;  %v306_v33 = vpack.c.bf16 %v298_v32, %v297_v31  ;;  %v1015_v35 = vld [vmem:[%s1107_s2] ss:$0 sm:$0xff]  ;;  %v860_v21 = vld [vmem:[%s1110_s5 + $0x18] sm:$0xff]  ;;  %v859_v25 = vld [vmem:[%s1110_s5 + $0x10] sm:$0xff] }
  0x15   : > { %867 = vmatpush.bf16.msra.mxu3 %v854_v22  ;;  %v861_v17 = vld [vmem:[%s1110_s5 + $0x20] sm:$0xff] }
  0x18   : > { %496 = vmatpush.bf16.msra.mxu1 %v853_v23 }
  0x19   : > { %868 = vmatpush.bf16.msra.mxu3 %v853_v23 }
  0x1c   : > { %497 = vmatpush.bf16.msra.mxu1 %v852_v26 }
  0x1d   : > { %869 = vmatpush.bf16.msra.mxu3 %v852_v26 }
  0x20   : > { %498 = vmatpush.bf16.msra.mxu1 %v851_v28 }
  0x21   : > { %870 = vmatpush.bf16.msra.mxu3 %v851_v28  ;;  %v857_v28 = vld [vmem:[%s1110_s5] sm:$0xff] }
  0x23   : > { %774 = vmatmul.msk.bf16.gmra.mxu0 %vm327_vm0, %v300_v7 }
  0x24   : > { %499 = vmatpush.bf16.msra.mxu1 %v850_v29 }
  0x25   : > { %871 = vmatpush.bf16.msra.mxu3 %v850_v29 }
  0x28   : > { %500 = vmatpush.bf16.msra.mxu1 %v849_v30 }
  0x29   : > { %872 = vmatpush.bf16.msra.mxu3 %v849_v30 }
  0x33   : > { %775 = vmatmul.msk.bf16.gmra.mxu0 %vm327_vm0, %v301_v10  ;;  %v864_v10 = vld [vmem:[%s1110_s5 + $0x38] sm:$0xff] }
  0x34   : > { %634 = vmatpush.bf16.msra.mxu2 %v864_v10  ;;  %873 = vmatpush.bf16.msrb.mxu3 %v864_v10 }
  0x38   : > { %635 = vmatpush.bf16.msra.mxu2 %v863_v14  ;;  %874 = vmatpush.bf16.msrb.mxu3 %v863_v14 }
  0x43   : > { %776 = vmatmul.msk.bf16.gmra.mxu0 %vm327_vm0, %v302_v13 }
  0x53   : > { %777 = vmatmul.msk.bf16.gmra.mxu0 %vm327_vm0, %v303_v16  ;;  %v862_v16 = vld [vmem:[%s1110_s5 + $0x28] sm:$0xff] }
  0x54   : > { %636 = vmatpush.bf16.msra.mxu2 %v862_v16  ;;  %875 = vmatpush.bf16.msrb.mxu3 %v862_v16 }
  0x58   : > { %637 = vmatpush.bf16.msra.mxu2 %v861_v17  ;;  %876 = vmatpush.bf16.msrb.mxu3 %v861_v17 }
  0x5c   : > { %638 = vmatpush.bf16.msra.mxu2 %v860_v21  ;;  %877 = vmatpush.bf16.msrb.mxu3 %v860_v21 }
  0x60   : > { %639 = vmatpush.bf16.msra.mxu2 %v859_v25  ;;  %878 = vmatpush.bf16.msrb.mxu3 %v859_v25 }
  0x63   : > { %778 = vmatmul.msk.bf16.gmra.mxu0 %vm327_vm0, %v304_v20 }
  0x73   : > { %779 = vmatmul.msk.bf16.gmra.mxu0 %vm327_vm0, %v305_v27  ;;  %v858_v27 = vld [vmem:[%s1110_s5 + $0x8] sm:$0xff] }
  0x74   : > { %640 = vmatpush.bf16.msra.mxu2 %v858_v27  ;;  %879 = vmatpush.bf16.msrb.mxu3 %v858_v27 }
  0x78   : > { %641 = vmatpush.bf16.msra.mxu2 %v857_v28  ;;  %880 = vmatpush.bf16.msrb.mxu3 %v857_v28  ;;  %v891_v28 = vld [vmem:[%s1111_s6] ss:$0 sm:$0xff] }
  0x83   : > { %780 = vmatmul.msk.bf16.gmra.mxu0 %vm327_vm0, %v306_v33 }
  0x90   : > { %v361_v34 = vpop.f32.mrf.mxu0 }
  0x91   : > { %v362_v36 = vadd.f32 %v1015_v35, %v361_v34 }
  0x93   : > { %v401_v39 = vmax.f32 %v362_v36, 0.0 }
  0x98   : > { %v363_v37 = vpop.f32.mrf.mxu0 }
  0x99   : > { %v364_v38 = vadd.f32 %v1015_v35, %v363_v37  ;;  %v890_v37 = vld [vmem:[%s1109_s4] ss:$0 sm:$0xff] }
  0x9b   : > { %v402_v40 = vmax.f32 %v364_v38, 0.0 }
  0x9d   : > { %v417_v41 = vpack.c.bf16 %v402_v40, %v401_v39 }
  0x9f   : > { %501 = vmatmul.bf16.vlgmr.msra.gmra.mxu1 %v417_v41 }
  0xa0   : > { %v366_v42 = vpop.f32.mrf.mxu0 }
  0xa1   : > { %v367_v43 = vadd.f32 %v1015_v35, %v366_v42 }
  0xa3   : > { %v403_v46 = vmax.f32 %v367_v43, 0.0 }
  0xa8   : > { %v368_v44 = vpop.f32.mrf.mxu0 }
  0xa9   : > { %v369_v45 = vadd.f32 %v1015_v35, %v368_v44 }
  0xab   : > { %v404_v47 = vmax.f32 %v369_v45, 0.0 }
  0xad   : > { %v418_v48 = vpack.c.bf16 %v404_v47, %v403_v46 }
  0xaf   : > { %506 = vmatmul.bf16.gmra.mxu1 %v418_v48 }
  0xb0   : > { %v371_v49 = vpop.f32.mrf.mxu0 }
  0xb1   : > { %v372_v50 = vadd.f32 %v1015_v35, %v371_v49 }
  0xb3   : > { %v405_v53 = vmax.f32 %v372_v50, 0.0 }
  0xb8   : > { %v373_v51 = vpop.f32.mrf.mxu0 }
  0xb9   : > { %v374_v52 = vadd.f32 %v1015_v35, %v373_v51 }
  0xbb   : > { %v406_v54 = vmax.f32 %v374_v52, 0.0 }
  0xbd   : > { %v419_v55 = vpack.c.bf16 %v406_v54, %v405_v53 }
  0xbf   : > { %511 = vmatmul.bf16.gmra.mxu1 %v419_v55 }
  0xc0   : > { %v376_v56 = vpop.f32.mrf.mxu0 }
  0xc1   : > { %v377_v57 = vadd.f32 %v1015_v35, %v376_v56 }
  0xc3   : > { %v407_v60 = vmax.f32 %v377_v57, 0.0 }
  0xc8   : > { %v378_v58 = vpop.f32.mrf.mxu0 }
  0xc9   : > { %v379_v59 = vadd.f32 %v1015_v35, %v378_v58 }
  0xcb   : > { %v408_v61 = vmax.f32 %v379_v59, 0.0 }
  0xcd   : > { %v420_v62 = vpack.c.bf16 %v408_v61, %v407_v60 }
  0xcf   : > { %516 = vmatmul.bf16.gmra.mxu1 %v420_v62 }
  0xd0   : > { %v381_v63 = vpop.f32.mrf.mxu0 }
  0xd1   : > { %v382_v0 = vadd.f32 %v1015_v35, %v381_v63 }
  0xd3   : > { %v409_v3 = vmax.f32 %v382_v0, 0.0 }
  0xd8   : > { %v383_v1 = vpop.f32.mrf.mxu0 }
  0xd9   : > { %v384_v2 = vadd.f32 %v1015_v35, %v383_v1 }
  0xdb   : > { %v410_v4 = vmax.f32 %v384_v2, 0.0 }
  0xdd   : > { %v421_v5 = vpack.c.bf16 %v410_v4, %v409_v3 }
  0xdf   : > { %521 = vmatmul.bf16.gmra.mxu1 %v421_v5 }
  0xe0   : > { %v386_v6 = vpop.f32.mrf.mxu0 }
  0xe1   : > { %v387_v7 = vadd.f32 %v1015_v35, %v386_v6 }
  0xe3   : > { %v411_v11 = vmax.f32 %v387_v7, 0.0 }
  0xe8   : > { %v388_v8 = vpop.f32.mrf.mxu0 }
  0xe9   : > { %v389_v9 = vadd.f32 %v1015_v35, %v388_v8 }
  0xeb   : > { %v412_v12 = vmax.f32 %v389_v9, 0.0 }
  0xed   : > { %v422_v13 = vpack.c.bf16 %v412_v12, %v411_v11 }
  0xef   : > { %526 = vmatmul.bf16.gmra.mxu1 %v422_v13 }
  0xf0   : > { %v391_v15 = vpop.f32.mrf.mxu0 }
  0xf1   : > { %v392_v18 = vadd.f32 %v1015_v35, %v391_v15 }
  0xf3   : > { %v413_v22 = vmax.f32 %v392_v18, 0.0 }
  0xf8   : > { %v393_v19 = vpop.f32.mrf.mxu0 }
  0xf9   : > { %v394_v20 = vadd.f32 %v1015_v35, %v393_v19 }
  0xfb   : > { %v414_v23 = vmax.f32 %v394_v20, 0.0 }
  0xfd   : > { %v423_v24 = vpack.c.bf16 %v414_v23, %v413_v22 }
  0xff   : > { %531 = vmatmul.bf16.vlgmr.msra.gmra.mxu3 %v423_v24 }
 0x100   : > { %v396_v26 = vpop.f32.mrf.mxu0 }
 0x101   : > { %v397_v29 = vadd.f32 %v1015_v35, %v396_v26 }
 0x103   : > { %v415_v32 = vmax.f32 %v397_v29, 0.0 }
 0x108   : > { %v398_v30 = vpop.f32.mrf.mxu0 }
 0x109   : > { %v399_v31 = vadd.f32 %v1015_v35, %v398_v30 }
 0x10b   : > { %v416_v33 = vmax.f32 %v399_v31, 0.0 }
 0x10d   : > { %v424_v34 = vpack.c.bf16 %v416_v33, %v415_v32 }
 0x10f   : > { %536 = vmatmul.bf16.gmra.mxu3 %v424_v34 }
 0x11c   : > { %v502_v36 = vpop.f32.mrf.mxu1 }
 0x11d   : > { %v503_v38 = vadd.f32 %v890_v37, %v502_v36 }
 0x11f   : > { %v542_v41 = vmax.f32 %v503_v38, 0.0 }
 0x124   : > { %v504_v39 = vpop.f32.mrf.mxu1 }
 0x125   : > { %v505_v40 = vadd.f32 %v890_v37, %v504_v39 }
 0x127   : > { %v543_v42 = vmax.f32 %v505_v40, 0.0 }
 0x129   : > { %v558_v43 = vpack.c.bf16 %v543_v42, %v542_v41 }
 0x12b   : > { %642 = vmatmul.bf16.vlgmr.msra.gmra.mxu2 %v558_v43 }
 0x12c   : > { %v507_v44 = vpop.f32.mrf.mxu1 }
 0x12d   : > { %v508_v45 = vadd.f32 %v890_v37, %v507_v44 }
 0x12f   : > { %v544_v47 = vmax.f32 %v508_v45, 0.0 }
 0x134   : > { %v509_v46 = vpop.f32.mrf.mxu1 }
 0x135   : > { %v510_v35 = vadd.f32 %v890_v37, %v509_v46 }
 0x137   : > { %v545_v48 = vmax.f32 %v510_v35, 0.0 }
 0x139   : > { %v559_v49 = vpack.c.bf16 %v545_v48, %v544_v47 }
 0x13b   : > { %647 = vmatmul.bf16.gmra.mxu2 %v559_v49 }
 0x13c   : > { %v512_v50 = vpop.f32.mrf.mxu1 }
 0x13d   : > { %v513_v51 = vadd.f32 %v890_v37, %v512_v50 }
 0x13f   : > { %v546_v54 = vmax.f32 %v513_v51, 0.0 }
 0x144   : > { %v514_v52 = vpop.f32.mrf.mxu1 }
 0x145   : > { %v515_v53 = vadd.f32 %v890_v37, %v514_v52 }
 0x147   : > { %v547_v55 = vmax.f32 %v515_v53, 0.0 }
 0x149   : > { %v560_v56 = vpack.c.bf16 %v547_v55, %v546_v54 }
 0x14b   : > { %652 = vmatmul.bf16.gmra.mxu2 %v560_v56 }
 0x14c   : > { %v517_v57 = vpop.f32.mrf.mxu1 }
 0x14d   : > { %v518_v58 = vadd.f32 %v890_v37, %v517_v57 }
 0x14f   : > { %v548_v61 = vmax.f32 %v518_v58, 0.0 }
 0x154   : > { %v519_v59 = vpop.f32.mrf.mxu1 }
 0x155   : > { %v520_v60 = vadd.f32 %v890_v37, %v519_v59 }
 0x157   : > { %v549_v62 = vmax.f32 %v520_v60, 0.0 }
 0x159   : > { %v561_v63 = vpack.c.bf16 %v549_v62, %v548_v61 }
 0x15b   : > { %657 = vmatmul.bf16.gmra.mxu2 %v561_v63 }
 0x15c   : > { %v522_v0 = vpop.f32.mrf.mxu1 }
 0x15d   : > { %v523_v1 = vadd.f32 %v890_v37, %v522_v0 }
 0x15f   : > { %v550_v4 = vmax.f32 %v523_v1, 0.0 }
 0x164   : > { %v524_v2 = vpop.f32.mrf.mxu1 }
 0x165   : > { %v525_v3 = vadd.f32 %v890_v37, %v524_v2 }
 0x167   : > { %v551_v5 = vmax.f32 %v525_v3, 0.0 }
 0x169   : > { %v562_v6 = vpack.c.bf16 %v551_v5, %v550_v4 }
 0x16b   : > { %662 = vmatmul.bf16.gmra.mxu2 %v562_v6 }
 0x16c   : > { %v527_v7 = vpop.f32.mrf.mxu1 }
 0x16d   : > { %v528_v8 = vadd.f32 %v890_v37, %v527_v7 }
 0x16f   : > { %v552_v11 = vmax.f32 %v528_v8, 0.0 }
 0x174   : > { %v529_v9 = vpop.f32.mrf.mxu1 }
 0x175   : > { %v530_v10 = vadd.f32 %v890_v37, %v529_v9 }
 0x177   : > { %v553_v12 = vmax.f32 %v530_v10, 0.0 }
 0x179   : > { %v563_v13 = vpack.c.bf16 %v553_v12, %v552_v11 }
 0x17b   : > { %667 = vmatmul.bf16.gmra.mxu2 %v563_v13 }
 0x182   : > { %v532_v14 = vpop.f32.mrf.mxu3 }
 0x183   : > { %v533_v15 = vadd.f32 %v890_v37, %v532_v14 }
 0x185   : > { %v554_v18 = vmax.f32 %v533_v15, 0.0 }
 0x18a   : > { %v534_v16 = vpop.f32.mrf.mxu3 }
 0x18b   : > { %v535_v17 = vadd.f32 %v890_v37, %v534_v16 }
 0x18d   : > { %v555_v19 = vmax.f32 %v535_v17, 0.0 }
 0x18f   : > { %v564_v20 = vpack.c.bf16 %v555_v19, %v554_v18 }
 0x191   : > { %672 = vmatmul.bf16.vlgmr.msrb.gmra.mxu3 %v564_v20 }
 0x192   : > { %v537_v21 = vpop.f32.mrf.mxu3 }
 0x193   : > { %v538_v22 = vadd.f32 %v890_v37, %v537_v21 }
 0x195   : > { %v556_v25 = vmax.f32 %v538_v22, 0.0 }
 0x19a   : > { %v539_v23 = vpop.f32.mrf.mxu3 }
 0x19b   : > { %v540_v24 = vadd.f32 %v890_v37, %v539_v23 }
 0x19d   : > { %v557_v26 = vmax.f32 %v540_v24, 0.0 }
 0x19f   : > { %v565_v27 = vpack.c.bf16 %v557_v26, %v556_v25 }
 0x1a1   : > { %677 = vmatmul.bf16.gmra.mxu3 %v565_v27 }
 0x1ae   : > { %v643_v29 = vpop.f32.mrf.mxu2 }
 0x1af   : > { %v644_v30 = vadd.f32 %v891_v28, %v643_v29 }
 0x1b1   : > { %684 = vst.msk [vmem:[%s1068_s12] sm:$0xff] %vm683_vm1, %v644_v30 }
 0x1b6   : > { %v645_v31 = vpop.f32.mrf.mxu2 }
 0x1b7   : > { %v646_v32 = vadd.f32 %v891_v28, %v645_v31 }
 0x1b9   : > { %685 = vst.msk [vmem:[%s1068_s12 + $0x8] sm:$0xff] %vm683_vm1, %v646_v32 }
 0x1be   : > { %v648_v33 = vpop.f32.mrf.mxu2 }
 0x1bf   : > { %v649_v34 = vadd.f32 %v891_v28, %v648_v33 }
 0x1c1   : > { %686 = vst.msk [vmem:[%s1068_s12 + $0x10] sm:$0xff] %vm683_vm1, %v649_v34 }
 0x1c6   : > { %v650_v36 = vpop.f32.mrf.mxu2 }
 0x1c7   : > { %v651_v37 = vadd.f32 %v891_v28, %v650_v36 }
 0x1c9   : > { %687 = vst.msk [vmem:[%s1068_s12 + $0x18] sm:$0xff] %vm683_vm1, %v651_v37 }
 0x1ce   : > { %v653_v38 = vpop.f32.mrf.mxu2 }
 0x1cf   : > { %v654_v39 = vadd.f32 %v891_v28, %v653_v38 }
 0x1d1   : > { %688 = vst.msk [vmem:[%s1068_s12 + $0x20] sm:$0xff] %vm683_vm1, %v654_v39 }
 0x1d6   : > { %v655_v40 = vpop.f32.mrf.mxu2 }
 0x1d7   : > { %v656_v41 = vadd.f32 %v891_v28, %v655_v40 }
 0x1d9   : > { %689 = vst.msk [vmem:[%s1068_s12 + $0x28] sm:$0xff] %vm683_vm1, %v656_v41 }
 0x1de   : > { %v658_v42 = vpop.f32.mrf.mxu2 }
 0x1df   : > { %v659_v43 = vadd.f32 %v891_v28, %v658_v42 }
 0x1e1   : > { %690 = vst.msk [vmem:[%s1068_s12 + $0x30] sm:$0xff] %vm683_vm1, %v659_v43 }
 0x1e6   : > { %v660_v44 = vpop.f32.mrf.mxu2 }
 0x1e7   : > { %v661_v45 = vadd.f32 %v891_v28, %v660_v44 }
 0x1e9   : > { %691 = vst.msk [vmem:[%s1068_s12 + $0x38] sm:$0xff] %vm683_vm1, %v661_v45 }
 0x1ee   : > { %v663_v46 = vpop.f32.mrf.mxu2 }
 0x1ef   : > { %v664_v35 = vadd.f32 %v891_v28, %v663_v46 }
 0x1f1   : > { %692 = vst.msk [vmem:[%s1068_s12 + $0x40] sm:$0xff] %vm683_vm1, %v664_v35 }
 0x1f6   : > { %v665_v47 = vpop.f32.mrf.mxu2 }
 0x1f7   : > { %v666_v48 = vadd.f32 %v891_v28, %v665_v47 }
 0x1f9   : > { %693 = vst.msk [vmem:[%s1068_s12 + $0x48] sm:$0xff] %vm683_vm1, %v666_v48 }
 0x1fe   : > { %v668_v49 = vpop.f32.mrf.mxu2 }
 0x1ff   : > { %v669_v50 = vadd.f32 %v891_v28, %v668_v49 }
 0x201   : > { %694 = vst.msk [vmem:[%s1068_s12 + $0x50] sm:$0xff] %vm683_vm1, %v669_v50 }
 0x206   : > { %v670_v51 = vpop.f32.mrf.mxu2 }
 0x207   : > { %v671_v52 = vadd.f32 %v891_v28, %v670_v51 }
 0x209   : > { %695 = vst.msk [vmem:[%s1068_s12 + $0x58] sm:$0xff] %vm683_vm1, %v671_v52 }
 0x214   : > { %v673_v53 = vpop.f32.mrf.mxu3 }
 0x215   : > { %v674_v54 = vadd.f32 %v891_v28, %v673_v53 }
 0x217   : > { %696 = vst.msk [vmem:[%s1068_s12 + $0x60] sm:$0xff] %vm683_vm1, %v674_v54 }
 0x21c   : > { %v675_v55 = vpop.f32.mrf.mxu3 }
 0x21d   : > { %v676_v56 = vadd.f32 %v891_v28, %v675_v55 }
 0x21f   : > { %697 = vst.msk [vmem:[%s1068_s12 + $0x68] sm:$0xff] %vm683_vm1, %v676_v56 }
 0x224   : > { %v678_v57 = vpop.f32.mrf.mxu3 }
 0x225   : > { %v679_v58 = vadd.f32 %v891_v28, %v678_v57 }
 0x227   : > { %698 = vst.msk [vmem:[%s1068_s12 + $0x70] sm:$0xff] %vm683_vm1, %v679_v58 }
 0x22c   : > { %v680_v59 = vpop.f32.mrf.mxu3 }
 0x22d   : > { %v681_v60 = vadd.f32 %v891_v28, %v680_v59 }
 0x22f   : > { %699 = vst.msk [vmem:[%s1068_s12 + $0x78] sm:$0xff] %vm683_vm1, %v681_v60 }
 0x230 PF: > { %s17_s24 = sadd.s32 1, %s898_s24  }
 0x231   : > { %p14_p4 = scmp.ge.s32.totalorder %s17_s24, 4  }
 0x233   :  { %16 = sbr.rel (!%p14_p4) target bundleno = 1 (0x1), region = 78 }

</bundles_post_ra>
